<compile_context>
chip_gen: v5e
topology: v5e:2x2
jax: 0.10.0
libtpu: 0.0.40
codegen_flags: <defaults>
</compile_context>

<pallas_src>
import jax
import jax.numpy as jnp
from jax.experimental import pallas as pl
from jax.experimental.pallas import tpu as pltpu


# ----------------------------------------------------------------------------
# Kernel
# ----------------------------------------------------------------------------
def _propogator_kernel(a_ref, sin_ref, sout_ref, cur_ref,
                       w_all_ref, w_h_ref, b_ref, out_ref):
    bt, tn, two_ne = a_ref.shape          # (Bt, Tn, 2*ne)
    ne = two_ne // 2
    d = cur_ref.shape[-1]                 # state_dim
    m = bt * tn                           # rows fed to the gate matmuls
    cdt = w_all_ref.dtype                 # matmul compute dtype (f32 or bf16)

    # Single HBM-sourced adjacency block, split in VMEM (no wrapper round trip).
    a_full = a_ref[...]
    a_in_blk = a_full[:, :, :ne]          # lane slice; free when ne % 128 == 0
    a_out_blk = a_full[:, :, ne:]

    # Batched adjacency matmuls on the MXU, f32 accumulation.
    a_in = jnp.einsum("bne,bed->bnd", a_in_blk, sin_ref[...],
                      preferred_element_type=jnp.float32)
    a_out = jnp.einsum("bne,bed->bnd", a_out_blk, sout_ref[...],
                       preferred_element_type=jnp.float32)

    cur = cur_ref[...].astype(jnp.float32)   # elementwise gate math stays f32

    # Flatten (Bt, Tn) -> m rows; relayout-free when Tn % 8 == 0 (the wrapper
    # only picks node tiles that are multiples of 8 or the full n_node).
    a_in2 = a_in.reshape(m, d)
    a_out2 = a_out.reshape(m, d)
    cur2 = cur.reshape(m, d)

    # One fused gate dot: rows [a_in | a_out | cur], columns [ r | z | h ].
    # W_all's cur-rows are zero in the h column, so cur only feeds r/z here;
    # the h pre-activation gets its (r*cur) contribution from the rescue dot.
    # NOTE: on the bf16 path the f32-accumulated a_in/a_out are cast back to
    # bf16 here; the small drift compounds over iterated GGNN propagation.
    cat = jnp.concatenate([a_in2, a_out2, cur2], axis=-1).astype(cdt)   # (m, 3d)
    pre = jnp.dot(cat, w_all_ref[...],
                  preferred_element_type=jnp.float32) + b_ref[...]      # (m, 3d)

    r = jax.nn.sigmoid(pre[:, :d])
    z = jax.nn.sigmoid(pre[:, d:2 * d])
    h_hat = jnp.tanh(pre[:, 2 * d:] +
                     jnp.dot((r * cur2).astype(cdt), w_h_ref[...],
                             preferred_element_type=jnp.float32))

    out = (1.0 - z) * cur2 + z * h_hat
    # TODO(synk): when D < 128 this store is lane-masked; a lane-dense
    # (Bt, Tn*D) output slab would need an in-kernel relayout (or zero-padding
    # D to 128 in the wrapper), so the natural (.., D) layout is kept.
    out_ref[...] = out.reshape(bt, tn, d).astype(out_ref.dtype)


# ----------------------------------------------------------------------------
# Wrapper helpers
# ----------------------------------------------------------------------------
def _tpu_vmem_bytes():
    """Physical VMEM per core; conservative 64 MiB (v7x) if unqueryable."""
    try:
        info = pltpu.get_tpu_info()
        v = getattr(info, "vmem_capacity_bytes", None)
        if v:
            return int(v)
    except Exception:
        pass
    return 64 * 1024 * 1024


def _default_matmul_dtype():
    """v7x MXU is bf16/fp8 native: default bf16 matmul inputs there."""
    try:
        kind = jax.devices()[0].device_kind.lower()
        if "v7" in kind:
            return jnp.bfloat16
    except Exception:
        pass
    return None


def _pick_tiles(B, n_node, ne, D, itemsize, budget):
    """Pick (batch tile, node tile) maximizing rows-per-step subject to a
    VMEM budget that includes double-buffered blocks AND f32 intermediates,
    preferring >= 2 total grid steps (megacore / v7x second TensorCore)."""
    tn_cands = sorted({t for t in range(8, n_node + 1, 8) if n_node % t == 0}
                      | {n_node})
    bt_cands = [b for b in range(1, B + 1) if B % b == 0]

    def footprint(bt, tn):
        m = bt * tn
        blocks = 2 * itemsize * (bt * tn * 2 * ne      # A (double buffered)
                                 + 2 * bt * ne * D     # state_in / state_out
                                 + 2 * bt * tn * D)    # state_cur + output
        inter = 4 * 16 * m * D + itemsize * bt * tn * ne   # f32 temps + A slice
        return blocks + inter

    multi_possible = (B > 1) or (min(tn_cands) < n_node)
    best_key, best = None, None
    for bt in bt_cands:
        for tn in tn_cands:
            steps = (B // bt) * (n_node // tn)
            if multi_possible and steps < 2:
                continue
            if footprint(bt, tn) > budget:
                continue
            key = (bt * tn, tn)
            if best_key is None or key > best_key:
                best_key, best = key, (bt, tn)
    if best is None:
        # TODO(synk): graphs whose minimal block still exceeds VMEM would need
        # an extra "arbitrary" grid axis tiling the ne contraction with a VMEM
        # f32 accumulator.
        best = (1, min(tn_cands))
    bt, tn = best
    return bt, tn, footprint(bt, tn)


# ----------------------------------------------------------------------------
# Public wrapper
# ----------------------------------------------------------------------------
def propogator_forward(state_in, state_out, state_cur, A, params, *,
                       matmul_dtype="auto"):
    """params = dict(wr, br, wz, bz, wt, bt) with wr/wz/wt already transposed
    to (3D, D) and biases (1, D) (i.e. y = x @ w + b)."""
    B, n_node, D = state_cur.shape
    ne = state_in.shape[1]                       # n_node * n_edge_types
    assert A.shape == (B, n_node, 2 * ne)
    out_dtype = state_cur.dtype

    if matmul_dtype == "auto":
        matmul_dtype = _default_matmul_dtype()

    # ---- one-time weight fusion (wrapper-side, tiny tensors) ----
    wr, wz, wt = params["wr"], params["wz"], params["wt"]
    br, bz, btb = params["br"], params["bz"], params["bt"]
    zeros_dd = jnp.zeros((D, D), wr.dtype)
    w_all = jnp.concatenate([
        jnp.concatenate([wr[:D],        wz[:D],        wt[:D]],       axis=1),
        jnp.concatenate([wr[D:2 * D],   wz[D:2 * D],   wt[D:2 * D]],  axis=1),
        jnp.concatenate([wr[2 * D:],    wz[2 * D:],    zeros_dd],     axis=1),
    ], axis=0)                                                        # (3D, 3D)
    w_cur_h = wt[2 * D:]                                              # (D, D)
    b_rzh = jnp.concatenate([br, bz, btb], axis=1).astype(jnp.float32)  # (1, 3D)

    state_cur_mm = state_cur
    if matmul_dtype is not None:
        cast = lambda x: x.astype(matmul_dtype)
        A = cast(A)
        state_in, state_out, state_cur_mm = (cast(state_in), cast(state_out),
                                             cast(state_cur))
        w_all, w_cur_h = cast(w_all), cast(w_cur_h)

    itemsize = jnp.dtype(A.dtype).itemsize
    vmem_phys = _tpu_vmem_bytes()
    budget = max(8 * 1024 * 1024, vmem_phys // 3)       # generation-aware
    bt_size, tn_size, step_bytes = _pick_tiles(B, n_node, ne, D, itemsize, budget)
    grid = (B // bt_size, n_node // tn_size)

    weight_bytes = ((w_all.size + w_cur_h.size) * itemsize
                    + b_rzh.size * 4)
    # TODO(synk): resident weights are still double-buffered by the default
    # pipeline; pl.Buffered(1) would shave ~weight_bytes of VMEM.
    vmem_limit = int(min(vmem_phys,
                         max(32 * 1024 * 1024,
                             int(1.25 * (step_bytes + 2 * weight_bytes))
                             + (4 << 20))))

    def blk_bn(shape):
        nd = len(shape)
        return pl.BlockSpec(shape, lambda b, n, _nd=nd: (b, n) + (0,) * (_nd - 2))

    def blk_b(shape):
        nd = len(shape)
        return pl.BlockSpec(shape, lambda b, n, _nd=nd: (b,) + (0,) * (_nd - 1))

    def resident(arr):
        nd = arr.ndim
        return pl.BlockSpec(arr.shape, lambda b, n, _nd=nd: (0,) * _nd)

    flops = int(B * n_node * (4 * ne * D + 20 * D * D))
    transcendentals = int(5 * B * n_node * D)            # 2 per sigmoid, 1 tanh
    bytes_accessed = int(
        sum(x.size * jnp.dtype(x.dtype).itemsize
            for x in (A, state_in, state_out, state_cur_mm,
                      w_all, w_cur_h, b_rzh))
        + B * n_node * D * jnp.dtype(out_dtype).itemsize)

    return pl.pallas_call(
        _propogator_kernel,
        out_shape=jax.ShapeDtypeStruct((B, n_node, D), out_dtype),
        grid_spec=pltpu.PrefetchScalarGridSpec(
            num_scalar_prefetch=0,
            grid=grid,
            in_specs=[
                blk_bn((bt_size, tn_size, 2 * ne)),     # A (split in kernel)
                blk_b((bt_size, ne, D)),                # state_in
                blk_b((bt_size, ne, D)),                # state_out
                blk_bn((bt_size, tn_size, D)),          # state_cur
                resident(w_all), resident(w_cur_h), resident(b_rzh),
            ],
            out_specs=blk_bn((bt_size, tn_size, D)),
        ),
        compiler_params=pltpu.CompilerParams(
            dimension_semantics=("parallel", "parallel"),
            vmem_limit_bytes=vmem_limit),
        cost_estimate=pl.CostEstimate(
            flops=flops,
            transcendentals=transcendentals,
            bytes_accessed=bytes_accessed),
    )(A, state_in, state_out, state_cur_mm, w_all, w_cur_h, b_rzh)


# ----------------------------------------------------------------------------
# Plain-JAX reference (matches the PyTorch module)
# ----------------------------------------------------------------------------
def _reference(state_in, state_out, state_cur, A, params, n_node, n_edge_types):
    ne = n_node * n_edge_types
    A_in, A_out = A[:, :, :ne], A[:, :, ne:]
    a_in = jnp.einsum("bne,bed->bnd", A_in, state_in)
    a_out = jnp.einsum("bne,bed->bnd", A_out, state_out)
    a = jnp.concatenate([a_in, a_out, state_cur], axis=2)
    r = jax.nn.sigmoid(a @ params["wr"] + params["br"])
    z = jax.nn.sigmoid(a @ params["wz"] + params["bz"])
    joined = jnp.concatenate([a_in, a_out, r * state_cur], axis=2)
    h_hat = jnp.tanh(joined @ params["wt"] + params["bt"])
    return (1.0 - z) * state_cur + z * h_hat


if __name__ == "__main__":
    # Small shapes consistent with the module.
    B, n_node, n_edge_types, D = 2, 8, 2, 32
    ne = n_node * n_edge_types

    key = jax.random.PRNGKey(0)
    ks = jax.random.split(key, 10)

    state_in = jax.random.normal(ks[0], (B, ne, D), jnp.float32)
    state_out = jax.random.normal(ks[1], (B, ne, D), jnp.float32)
    state_cur = jax.random.normal(ks[2], (B, n_node, D), jnp.float32)
    A = jax.random.uniform(ks[3], (B, n_node, 2 * ne), jnp.float32)

    # Linear(3D -> D) params stored transposed: (3D, D) weights, (1, D) biases.
    bound = 1.0 / jnp.sqrt(3.0 * D)
    params = {
        "wr": jax.random.uniform(ks[4], (3 * D, D), jnp.float32, -bound, bound),
        "br": jax.random.uniform(ks[5], (1, D), jnp.float32, -bound, bound),
        "wz": jax.random.uniform(ks[6], (3 * D, D), jnp.float32, -bound, bound),
        "bz": jax.random.uniform(ks[7], (1, D), jnp.float32, -bound, bound),
        "wt": jax.random.uniform(ks[8], (3 * D, D), jnp.float32, -bound, bound),
        "bt": jax.random.uniform(ks[9], (1, D), jnp.float32, -bound, bound),
    }

    ref = _reference(state_in, state_out, state_cur, A, params,
                     n_node, n_edge_types)

    # f32 matmul path: exact (tight tolerance).
    out_f32 = propogator_forward(state_in, state_out, state_cur, A, params,
                                 matmul_dtype=None)
    out_f32 = jax.block_until_ready(out_f32)
    assert out_f32.shape == (B, n_node, D)
    assert jnp.allclose(out_f32, ref, atol=1e-5, rtol=1e-5), "f32 mismatch"

    # bf16 matmul path (v6e/v7x): f32 accumulation + f32 gate math.
    out_bf16 = propogator_forward(state_in, state_out, state_cur, A, params,
                                  matmul_dtype=jnp.bfloat16)
    out_bf16 = jax.block_until_ready(out_bf16)
    assert jnp.allclose(out_bf16, ref, atol=1e-1, rtol=1e-1), "bf16 mismatch"

    # Auto path (bf16 on v7x, f32 elsewhere) — loose tolerance covers both.
    out_auto = propogator_forward(state_in, state_out, state_cur, A, params)
    out_auto = jax.block_until_ready(out_auto)
    assert jnp.allclose(out_auto, ref, atol=1e-1, rtol=1e-1), "auto mismatch"

    print("KERNEL_OK")
</pallas_src>

<mosaic_0001>
module attributes {stable_mosaic.version = 11 : i64} {
  func.func @_propogator_kernel(%arg0: i32, %arg1: i32, %arg2: memref<1x8x32xf32, #tpu.memory_space<vmem>>, %arg3: memref<1x16x32xf32, #tpu.memory_space<vmem>>, %arg4: memref<1x16x32xf32, #tpu.memory_space<vmem>>, %arg5: memref<1x8x32xf32, #tpu.memory_space<vmem>>, %arg6: memref<96x96xf32, #tpu.memory_space<vmem>>, %arg7: memref<32x32xf32, #tpu.memory_space<vmem>>, %arg8: memref<1x96xf32, #tpu.memory_space<vmem>>, %arg9: memref<1x8x32xf32, #tpu.memory_space<vmem>>) attributes {dimension_semantics = [#tpu.dimension_semantics<parallel>, #tpu.dimension_semantics<parallel>], iteration_bounds = array<i64: 2, 1>, scalar_prefetch = 0 : i64, scratch_operands = 0 : i64, tpu.core_type = #tpu.core_type<tc>, window_params = [{transform_indices = @transform_0, window_bounds = array<i64: 1, 8, 32>}, {transform_indices = @transform_1, window_bounds = array<i64: 1, 16, 32>}, {transform_indices = @transform_2, window_bounds = array<i64: 1, 16, 32>}, {transform_indices = @transform_3, window_bounds = array<i64: 1, 8, 32>}, {pipeline_mode = #tpu.pipeline_mode<synchronous>, transform_indices = @transform_4, window_bounds = array<i64: 96, 96>}, {pipeline_mode = #tpu.pipeline_mode<synchronous>, transform_indices = @transform_5, window_bounds = array<i64: 32, 32>}, {pipeline_mode = #tpu.pipeline_mode<synchronous>, transform_indices = @transform_6, window_bounds = array<i64: 1, 96>}, {transform_indices = @transform_7, window_bounds = array<i64: 1, 8, 32>}]} {
    %c0 = arith.constant 0 : index
    %c0_0 = arith.constant 0 : index
    %c0_1 = arith.constant 0 : index
    %0 = vector.load %arg2[%c0, %c0_0, %c0_1] : memref<1x8x32xf32, #tpu.memory_space<vmem>>, vector<1x8x32xf32>
    %1 = vector.extract_strided_slice %0 {offsets = [0, 0, 0], sizes = [1, 8, 16], strides = [1, 1, 1]} : vector<1x8x32xf32> to vector<1x8x16xf32>
    %2 = vector.extract_strided_slice %0 {offsets = [0, 0, 16], sizes = [1, 8, 16], strides = [1, 1, 1]} : vector<1x8x32xf32> to vector<1x8x16xf32>
    %c0_2 = arith.constant 0 : index
    %c0_3 = arith.constant 0 : index
    %c0_4 = arith.constant 0 : index
    %3 = vector.load %arg3[%c0_2, %c0_3, %c0_4] : memref<1x16x32xf32, #tpu.memory_space<vmem>>, vector<1x16x32xf32>
    "tpu.trace_start"() <{level = 10 : i32, message = "bne,bed->bnd"}> : () -> ()
    %cst = arith.constant dense<0.000000e+00> : vector<1x8x32xf32>
    %4 = tpu.matmul %1, %3, %cst {dimension_numbers = #tpu.dot_dimension_numbers<[2], [1], [1], [2], [0, 0, 0, 1, 1, 2], [0], [0]>} : vector<1x8x16xf32>, vector<1x16x32xf32>, vector<1x8x32xf32> -> vector<1x8x32xf32>
    "tpu.trace_stop"() : () -> ()
    %c0_5 = arith.constant 0 : index
    %c0_6 = arith.constant 0 : index
    %c0_7 = arith.constant 0 : index
    %5 = vector.load %arg4[%c0_5, %c0_6, %c0_7] : memref<1x16x32xf32, #tpu.memory_space<vmem>>, vector<1x16x32xf32>
    "tpu.trace_start"() <{level = 10 : i32, message = "bne,bed->bnd"}> : () -> ()
    %cst_8 = arith.constant dense<0.000000e+00> : vector<1x8x32xf32>
    %6 = tpu.matmul %2, %5, %cst_8 {dimension_numbers = #tpu.dot_dimension_numbers<[2], [1], [1], [2], [0, 0, 0, 1, 1, 2], [0], [0]>} : vector<1x8x16xf32>, vector<1x16x32xf32>, vector<1x8x32xf32> -> vector<1x8x32xf32>
    "tpu.trace_stop"() : () -> ()
    %c0_9 = arith.constant 0 : index
    %c0_10 = arith.constant 0 : index
    %c0_11 = arith.constant 0 : index
    %7 = vector.load %arg5[%c0_9, %c0_10, %c0_11] : memref<1x8x32xf32, #tpu.memory_space<vmem>>, vector<1x8x32xf32>
    %8 = vector.shape_cast %4 : vector<1x8x32xf32> to vector<8x32xf32>
    %9 = vector.shape_cast %6 : vector<1x8x32xf32> to vector<8x32xf32>
    %10 = vector.shape_cast %7 : vector<1x8x32xf32> to vector<8x32xf32>
    %11 = tpu.concatenate %8, %9, %10 in 1 : vector<8x32xf32>, vector<8x32xf32>, vector<8x32xf32> -> vector<8x96xf32>
    %c0_12 = arith.constant 0 : index
    %c0_13 = arith.constant 0 : index
    %12 = vector.load %arg6[%c0_12, %c0_13] : memref<96x96xf32, #tpu.memory_space<vmem>>, vector<96x96xf32>
    %cst_14 = arith.constant dense<0.000000e+00> : vector<8x96xf32>
    %13 = tpu.matmul %11, %12, %cst_14 {dimension_numbers = #tpu.dot_dimension_numbers<[1], [0], [0], [1], [0, 0, 1, 1], [], []>} : vector<8x96xf32>, vector<96x96xf32>, vector<8x96xf32> -> vector<8x96xf32>
    %c0_15 = arith.constant 0 : index
    %c0_16 = arith.constant 0 : index
    %14 = vector.load %arg8[%c0_15, %c0_16] : memref<1x96xf32, #tpu.memory_space<vmem>>, vector<1x96xf32>
    %15 = vector.broadcast %14 : vector<1x96xf32> to vector<8x96xf32>
    %16 = arith.addf %13, %15 : vector<8x96xf32>
    %17 = vector.extract_strided_slice %16 {offsets = [0, 0], sizes = [8, 32], strides = [1, 1]} : vector<8x96xf32> to vector<8x32xf32>
    %18 = arith.negf %17 : vector<8x32xf32>
    %19 = math.exp %18 : vector<8x32xf32>
    %cst_17 = arith.constant 1.000000e+00 : f32
    %20 = vector.broadcast %cst_17 : f32 to vector<8x32xf32>
    %21 = arith.addf %20, %19 : vector<8x32xf32>
    %22 = arith.divf %20, %21 : vector<8x32xf32>
    %23 = vector.extract_strided_slice %16 {offsets = [0, 32], sizes = [8, 32], strides = [1, 1]} : vector<8x96xf32> to vector<8x32xf32>
    %24 = arith.negf %23 : vector<8x32xf32>
    %25 = math.exp %24 : vector<8x32xf32>
    %cst_18 = arith.constant 1.000000e+00 : f32
    %26 = vector.broadcast %cst_18 : f32 to vector<8x32xf32>
    %27 = arith.addf %26, %25 : vector<8x32xf32>
    %28 = arith.divf %26, %27 : vector<8x32xf32>
    %29 = vector.extract_strided_slice %16 {offsets = [0, 64], sizes = [8, 32], strides = [1, 1]} : vector<8x96xf32> to vector<8x32xf32>
    %30 = arith.mulf %22, %10 : vector<8x32xf32>
    %c0_19 = arith.constant 0 : index
    %c0_20 = arith.constant 0 : index
    %31 = vector.load %arg7[%c0_19, %c0_20] : memref<32x32xf32, #tpu.memory_space<vmem>>, vector<32x32xf32>
    %cst_21 = arith.constant dense<0.000000e+00> : vector<8x32xf32>
    %32 = tpu.matmul %30, %31, %cst_21 {dimension_numbers = #tpu.dot_dimension_numbers<[1], [0], [0], [1], [0, 0, 1, 1], [], []>} : vector<8x32xf32>, vector<32x32xf32>, vector<8x32xf32> -> vector<8x32xf32>
    %33 = arith.addf %29, %32 : vector<8x32xf32>
    %34 = math.tanh %33 : vector<8x32xf32>
    %cst_22 = arith.constant 1.000000e+00 : f32
    %35 = vector.broadcast %cst_22 : f32 to vector<8x32xf32>
    %36 = arith.subf %35, %28 : vector<8x32xf32>
    %37 = arith.mulf %36, %10 : vector<8x32xf32>
    %38 = arith.mulf %28, %34 : vector<8x32xf32>
    %39 = arith.addf %37, %38 : vector<8x32xf32>
    %40 = vector.shape_cast %39 : vector<8x32xf32> to vector<1x8x32xf32>
    %c0_23 = arith.constant 0 : index
    %c0_24 = arith.constant 0 : index
    %c0_25 = arith.constant 0 : index
    %41 = vector.load %arg9[%c0_23, %c0_24, %c0_25] : memref<1x8x32xf32, #tpu.memory_space<vmem>>, vector<1x8x32xf32>
    tpu.vector_store %arg9[%c0_23, %c0_24, %c0_25], %40 {strides = array<i32>} : memref<1x8x32xf32, #tpu.memory_space<vmem>>, vector<1x8x32xf32>,
    return
  }
  func.func @transform_0(%arg0: i32, %arg1: i32) -> (i32, i32, i32) {
    %c0_i32 = arith.constant 0 : i32
    %c0_i32_0 = arith.constant 0 : i32
    return %arg0, %arg1, %c0_i32 : i32, i32, i32
  }
  func.func @transform_1(%arg0: i32, %arg1: i32) -> (i32, i32, i32) {
    %c0_i32 = arith.constant 0 : i32
    %c0_i32_0 = arith.constant 0 : i32
    %c0_i32_1 = arith.constant 0 : i32
    return %arg0, %c0_i32, %c0_i32_0 : i32, i32, i32
  }
  func.func @transform_2(%arg0: i32, %arg1: i32) -> (i32, i32, i32) {
    %c0_i32 = arith.constant 0 : i32
    %c0_i32_0 = arith.constant 0 : i32
    %c0_i32_1 = arith.constant 0 : i32
    return %arg0, %c0_i32, %c0_i32_0 : i32, i32, i32
  }
  func.func @transform_3(%arg0: i32, %arg1: i32) -> (i32, i32, i32) {
    %c0_i32 = arith.constant 0 : i32
    %c0_i32_0 = arith.constant 0 : i32
    return %arg0, %arg1, %c0_i32 : i32, i32, i32
  }
  func.func @transform_4(%arg0: i32, %arg1: i32) -> (i32, i32) {
    %c0_i32 = arith.constant 0 : i32
    %c0_i32_0 = arith.constant 0 : i32
    %c0_i32_1 = arith.constant 0 : i32
    return %c0_i32, %c0_i32_0 : i32, i32
  }
  func.func @transform_5(%arg0: i32, %arg1: i32) -> (i32, i32) {
    %c0_i32 = arith.constant 0 : i32
    %c0_i32_0 = arith.constant 0 : i32
    %c0_i32_1 = arith.constant 0 : i32
    return %c0_i32, %c0_i32_0 : i32, i32
  }
  func.func @transform_6(%arg0: i32, %arg1: i32) -> (i32, i32) {
    %c0_i32 = arith.constant 0 : i32
    %c0_i32_0 = arith.constant 0 : i32
    %c0_i32_1 = arith.constant 0 : i32
    return %c0_i32, %c0_i32_0 : i32, i32
  }
  func.func @transform_7(%arg0: i32, %arg1: i32) -> (i32, i32, i32) {
    %c0_i32 = arith.constant 0 : i32
    %c0_i32_0 = arith.constant 0 : i32
    return %arg0, %arg1, %c0_i32 : i32, i32, i32
  }
}

</mosaic_0001>

<bundles_post_ra>
// kernel: tpu_custom_call.1
= control target key start
LH: loop header
LB: loop body
LE: loop exit
PB: predicated region body
PF: predicated region fallthrough
CT: control target
= control target key end

     0   :  { %s1531_s0 = inlined_call_operand.hbm [shape: f32[2,8,32], index: 0, kind: input, shape index: {}]   ;;  %s1532_s1 = inlined_call_operand.hbm [shape: f32[2,16,32], index: 1, kind: input, shape index: {}]   ;;  %s1533_s2 = inlined_call_operand.hbm [shape: f32[2,16,32], index: 2, kind: input, shape index: {}]   ;;  %s1534_s3 = inlined_call_operand.hbm [shape: f32[2,8,32], index: 3, kind: input, shape index: {}]   ;;  %s1535_s4 = inlined_call_operand.hbm [shape: f32[96,96], index: 4, kind: input, shape index: {}]   ;;  %s1536_s5 = inlined_call_operand.hbm [shape: f32[32,32], index: 5, kind: input, shape index: {}]   ;;  %s1537_s6 = inlined_call_operand.vmem [shape: f32[1,96], index: 6, kind: input, shape index: {}]   ;;  %s1538_s7 = inlined_call_operand.hbm [shape: f32[2,8,32], index: 7, kind: output, shape index: {}]  }
   0x1   :  { %1551 = sst [smem:[#allocation27_spill]] %s1532_s1 }
   0x2   :  { %1552 = sst [smem:[#allocation28_spill]] %s1535_s4 }
   0x3   :  { %1553 = sst [smem:[#allocation29_spill]] %s1538_s7 }
   0x4   :  { %12 = vsyncpa [#allocation3], 0 }
   0x5   :  { %14 = vsyncpa [#allocation3 + $0x1], 0 }
   0x6   :  { %15 = vsyncpa [#allocation6], 0 }
   0x7   :  { %17 = vsyncpa [#allocation6 + $0x1], 0 }
   0x8   :  { %18 = vsyncpa [#allocation9], 0 }
   0x9   :  { %20 = vsyncpa [#allocation9 + $0x1], 0 }
   0xa   :  { %21 = vsyncpa [#allocation12], 0 }
   0xb   :  { %22 = vsyncpa [#allocation4], 0 }
   0xc   :  { %24 = vsyncpa [#allocation4 + $0x1], 0  ;;  %s1301_s24 = smov 0   ;;  %s1303_s25 = smov 0  }
   0xd   :  { %s1305_s26 = smov 0   ;;  %s1307_s27 = smov 0  }
   0xe   :  { %s1309_s28 = smov 0   ;;  %s1311_s29 = smov 0  }
   0xf LB: > { %1554 = sst [smem:[#allocation20_spill]] %s1231_s24  ;;  %s1332_s30 = sadd.s32 4294967295, %s1251_s29   ;;  %s1251_s29 = sphi %s1311_s29, %s30_s29   ;;  %s1247_s28 = sphi %s1309_s28, %s1584_s28   ;;  %s1243_s27 = sphi %s1307_s27, %s1583_s27   ;;  %s1239_s26 = sphi %s1305_s26, %s1579_s26   ;;  %s1235_s25 = sphi %s1303_s25, %s1582_s25   ;;  %s1231_s24 = sphi %s1301_s24, %s1581_s24  }
  0x10   : > { %1555 = sst [smem:[#allocation21_spill]] %s1239_s26  ;;  %s828_s8 = sadd.s32 4294967294, %s1251_s29  }
  0x11   : > { %1556 = sst [smem:[#allocation22_spill]] %s1243_s27  ;;  %p64_p0 = scmp.ne.s32.totalorder %s1235_s25, %s1231_s24 }
  0x12   : > { %p65_p1 = scmp.eq.s32.totalorder %s1332_s30, 0  ;;  %p233_p2 = scmp.eq.s32.totalorder %s1332_s30, 1 }
  0x13   : > { %p239_p3 = scmp.eq.s32.totalorder %s828_s8, 1  ;;  %p829_p5 = scmp.ge.s32.totalorder %s1251_s29, 1 }
  0x14   : > { %p1341_p4 = por %p65_p1, %p64_p0  ;;  %p246_p7 = scmp.lt.s32.totalorder %s1251_s29, 3 }
  0x15   : > { %p1346_p6 = por %p239_p3, %p64_p0  ;;  %s1560_s4 = sld [smem:[#allocation28_spill]] }
  0x16   : > { %p1354_p8 = pnand %p829_p5, %p246_p7  ;;  %s1253_s15 = smov [#allocation10]  }
  0x17   : > { %s1558_s10 = scalar_select %p1346_p6, 1, 0 }
  0x18   : > { %p880_p9 = pneg %p1354_p8  ;;  %s259_s16 = sshll.u32 %s1253_s15, 4  ;;  %s260_s16 = int_to_ptr.vmem [resolvable:$true] %s259_s16 }
  0x19   : > { %1559 = sst [smem:[#allocation23_spill]] %s1558_s10  ;;  %s1539_s18 = smov 128  }
  0x1a   : > { %p1362_p10 = pnand %p880_p9, %p65_p1  ;;  %s1541_s19 = smov 8  }
  0x1b   : > { %s257_s13 = sshll.u32 %s1560_s4, 4  ;;  %s42_s20 = sadd.s32 1, %s1247_s28  ;;  %s258_s13 = int_to_ptr.hbm [resolvable:$true] %s257_s13 }
  0x1c   : > { %883 = dma.hbm_to_vmem [thread:$0]  (!%p1362_p10), %s258_s13, 1536, %s260_s16, [#allocation9], %s1539_s18, %s1539_s18, %s1541_s19  }
  0x1d   : > { %p44_p12 = scmp.ge.s32.totalorder %s42_s20, 2  ;;  %s51_s21 = sadd.s32 1, %s1239_s26 }
  0x1e   : > { %p58_p13 = scmp.ne.s32.totalorder %s1239_s26, %s1235_s25  ;;  %p59_p0 = scmp.eq.s32.totalorder %s1251_s29, 0 }
  0x1f   : > { %s1586_s20 = smov (%p44_p12, %s42_s20), 0  ;;  %p906_p7 = scmp.lt.s32.totalorder %s1251_s29, 2 }
  0x20   : > { %1563 = sst [smem:[#allocation24_spill]] %s1586_s20  ;;  %p60_p3 = por %p59_p0, %p58_p13 }
  0x21   : > { %p1381_p5 = por %p233_p2, %p58_p13  ;;  %s46_s23 = ssub.s32 %s1247_s28, %s1586_s20 }
  0x22   : > { %p49_p9 = scmp.eq.s32.totalorder %s46_s23, 0  ;;  %s1389_s8 = sand.u32 1, %s1239_s26  }
  0x23   : > { %s1564_s22 = scalar_select %p1381_p5, 1, 0 }
  0x24   : > { %p1391_p11 = pnand %p906_p7, %p60_p3  ;;  %s1550_s12 = sand.u32 1, %s1251_s29  }
  0x25   : > { %1565 = sst [smem:[#allocation25_spill]] %s1564_s22  ;;  %s835_s15 = sshll.u32 %s1389_s8, 4 }
  0x26   : > { %s1397_s13 = scalar_select %p49_p9, %s1239_s26, %s51_s21  }
  0x27   : > { %s860_s16 = sshll.u32 %s1247_s28, 4  ;;  %s1568_s1 = sld [smem:[#allocation27_spill]] }
  0x28   : > { %1567 = sst [smem:[#allocation26_spill]] %s1397_s13  ;;  %s314_s10 = scalar_lea.vmem [#allocation5], %s835_s15 }
  0x29   : > { %s322_s23 = sshll.u32 %s314_s10, 4  ;;  %s1406_s24 = scalar_lea.sflag [#allocation6], %s1550_s12  ;;  %s323_s23 = int_to_ptr.vmem [resolvable:$true] %s322_s23 }
  0x2a   : > { %s1569_s21 = smov 8   ;;  %s1570_s13 = smov 128  }
  0x2b   : > { %s336_s10 = scalar_lea.vmem [#allocation7], %s835_s15  ;;  %s271_s12 = sshll.u32 %s1536_s5, 4  ;;  %s272_s12 = int_to_ptr.hbm [resolvable:$true] %s271_s12 }
  0x2c   : > { %s1256_s27 = smov [#allocation11]   ;;  %s833_s26 = sshll.u32 %s1389_s8, 3 }
  0x2d   : > { %s319_s4 = scalar_lea.hbm %s1568_s1, %s860_s16  ;;  %s344_s1 = sshll.u32 %s336_s10, 4  ;;  %s345_s1 = int_to_ptr.vmem [resolvable:$true] %s344_s1 }
  0x2e   : > { %s320_s20 = sshll.u32 %s319_s4, 4  ;;  %s341_s4 = scalar_lea.hbm %s1533_s2, %s860_s16  ;;  %s321_s20 = int_to_ptr.hbm [resolvable:$true] %s320_s20 }
  0x2f   : > { %893 = dma.hbm_to_vmem [thread:$0]  (!%p1391_p11), %s321_s20, 256, %s323_s23, %s1406_s24, %s1570_s13, %s1570_s13, %s1569_s21  }
  0x30   : > { %s342_s19 = sshll.u32 %s341_s4, 4  ;;  %s273_s20 = sshll.u32 %s1256_s27, 4  ;;  %s343_s19 = int_to_ptr.hbm [resolvable:$true] %s342_s19  ;;  %s274_s20 = int_to_ptr.vmem [resolvable:$true] %s273_s20 }
  0x31   : > { %886 = dma.hbm_to_vmem [thread:$0]  (!%p1362_p10), %s272_s12, 512, %s274_s20, [#allocation12], %s1570_s13, %s1570_s13, %s1569_s21  }
  0x32   : > { %s834_s15 = sshll.u32 %s1247_s28, 3  ;;  %s294_s18 = scalar_lea.vmem [#allocation2], %s833_s26 }
  0x33   : > { %s299_s7 = scalar_lea.hbm %s1531_s0, %s834_s15  ;;  %s303_s4 = sshll.u32 %s294_s18, 4  ;;  %s304_s4 = int_to_ptr.vmem [resolvable:$true] %s303_s4 }
  0x34   : > { %s301_s22 = sshll.u32 %s299_s7, 4  ;;  %s291_s27 = scalar_lea.sflag [#allocation3], %s1389_s8  ;;  %s302_s22 = int_to_ptr.hbm [resolvable:$true] %s301_s22 }
  0x35   : > { %890 = dma.hbm_to_vmem [thread:$0]  (!%p1391_p11), %s302_s22, 128, %s304_s4, %s291_s27  }
  0x36   : > { %s363_s12 = scalar_lea.hbm %s1534_s3, %s834_s15  ;;  %s358_s16 = scalar_lea.vmem [#allocation8], %s833_s26 }
  0x37   : > { %896 = dma.hbm_to_vmem [thread:$0]  (!%p1391_p11), %s343_s19, 256, %s345_s1, %s1406_s24, %s1570_s13, %s1570_s13, %s1569_s21  }
  0x38   : > { %s365_s20 = sshll.u32 %s363_s12, 4  ;;  %s367_s23 = sshll.u32 %s358_s16, 4  ;;  %s366_s20 = int_to_ptr.hbm [resolvable:$true] %s365_s20  ;;  %s368_s23 = int_to_ptr.vmem [resolvable:$true] %s367_s23 }
  0x39   : > { %s1571_s7 = sand.u32 1, %s1251_s29   ;;  %376 = sbr.rel (%p1354_p8) target bundleno = 1065 (0x429), region = 48 }
  0x3a   : > { %s355_s18 = scalar_lea.sflag [#allocation9], %s1571_s7  ;;  %s1449_s8 = sand.u32 (!%p1354_p8), 1, %s1235_s25  }
  0x3b   : > { %899 = dma.hbm_to_vmem [thread:$0]  (!%p1391_p11), %s366_s20, 128, %s368_s23, %s355_s18  }
  0x3c   : > { %s1452_s15 = sshll.u32 (!%p1354_p8), %s1449_s8, 3  ;;  %s379_s1 = scalar_lea.sflag (!%p1354_p8), [#allocation3], %s1449_s8 }
  0x3d   : > { %s382_s24 = scalar_lea.vmem (!%p1354_p8), [#allocation2], %s1452_s15 }
  0x3e   : > { %1206 = dma.done.wait (%p1341_p4), %s379_s1, 128  }
  0x3f   : > { %1208 = vsyncadd (%p1341_p4), %s379_s1, 4294967168  ;;  %s388_s14 = sand.u32 1, %s1332_s30   ;;  %s845_s11 = sshll.u32 %s1449_s8, 4 }
  0x40   : > { %s389_s13 = scalar_lea.sflag [#allocation6], %s388_s14  ;;  %s392_s21 = scalar_lea.vmem [#allocation5], %s845_s11 }
  0x41   : > { %1210 = dma.done.wait (%p1341_p4), %s389_s13, 512  }
  0x42   : > { %1212 = vsyncadd (%p1341_p4), %s389_s13, 4294966784  ;;  %s402_s19 = scalar_lea.vmem [#allocation7], %s845_s11  ;;  %s409_s26 = scalar_lea.sflag [#allocation9], %s388_s14 }
  0x43   : > { %s412_s22 = scalar_lea.vmem [#allocation8], %s1452_s15 }
  0x44   : > { %1214 = dma.done.wait (%p1341_p4), %s409_s26, 128  }
  0x45   : > { %1216 = vsyncadd (%p1341_p4), %s409_s26, 4294967168 }
  0x46   : > { %1218 = dma.done.wait (%p65_p1), [#allocation9], 1536  }
  0x47   : > { %1220 = vsyncadd (%p65_p1), [#allocation9], 4294965760 }
  0x48   : > { %1222 = dma.done.wait (%p65_p1), [#allocation12], 512  }
  0x49   : > { %1224 = vsyncadd (%p65_p1), [#allocation12], 4294966784  ;;  %v469_v0 = vld [vmem:[%s382_s24] sm:$0xff]  ;;  %v496_v2 = vld [vmem:[%s402_s19] sm:$0xff]  ;;  %s1257_s4 = smov 112   ;;  %vm472_vm0 = vcmask 130048  }
  0x4a   : > { %v497_v1 = vld [vmem:[%s402_s19 + $0x8] sm:$0xff]  ;;  %498 = vrot.lane.b32.xlu0 %v469_v0, %s1257_s4  ;;  %v470_v4 = vld [vmem:[%s392_s21] sm:$0xff]  ;;  %s1258_s30 = smov 64   ;;  %s1259_s9 = smov 32   ;;  %vm531_vm1 = vcmask 261120   ;;  %vm533_vm2 = vcmask 523264  }
  0x4b   : > { %516 = vmatpush.msra.mxu1 %v497_v1  ;;  %v471_v3 = vld [vmem:[%s392_s21 + $0x8] sm:$0xff]  ;;  %v1479_v6 = vld [vmem:[%s412_s22] sm:$0xff]  ;;  %v543_v10 = vld [vmem:[#allocation10 + $0x40] sm:$0xff]  ;;  %vm551_vm3 = vcmask 785408   ;;  %s1572_s10 = sld [smem:[#allocation22_spill]]  ;;  %s1260_s12 = smov 96  }
  0x4c   : > { %490 = vmatpush.msra.mxu0 %v471_v3  ;;  %v546_v7 = vld [vmem:[#allocation10 + $0x58] sm:$0xff]  ;;  %v545_v8 = vld [vmem:[#allocation10 + $0x50] sm:$0xff]  ;;  %528 = vrot.lane.b32.xlu1 %v1479_v6, %s1258_s30  ;;  %v544_v9 = vld [vmem:[#allocation10 + $0x48] sm:$0xff]  ;;  %s1574_s18 = sld [smem:[#allocation29_spill]]  ;;  %s468_s24 = scalar_lea.vmem [#allocation13], %s1452_s15 }
  0x4d   : > { %517 = vmatpush.msra.mxu1 %v496_v2  ;;  %559 = vmatpush.msra.mxu2 %v546_v7  ;;  %v542_v11 = vld [vmem:[#allocation10 + $0x38] sm:$0xff]  ;;  %v541_v12 = vld [vmem:[#allocation10 + $0x30] sm:$0xff]  ;;  %v540_v13 = vld [vmem:[#allocation10 + $0x28] sm:$0xff]  ;;  %s658_s14 = sshll.u32 %s468_s24, 4  ;;  %s645_s13 = scalar_lea.sflag [#allocation4], %s1449_s8  ;;  %s659_s14 = int_to_ptr.vmem [resolvable:$true] %s658_s14 }
  0x4e   : > { %491 = vmatpush.msra.mxu0 %v470_v4  ;;  %629 = vrot.lane.b32.xlu2 %v1479_v6, %s1259_s9  ;;  %v539_v14 = vld [vmem:[#allocation10 + $0x20] sm:$0xff]  ;;  %v538_v15 = vld [vmem:[#allocation10 + $0x18] sm:$0xff]  ;;  %v537_v16 = vld [vmem:[#allocation10 + $0x10] sm:$0xff] }
  0x4f   : > { %851 = vmatmul.msk.f32.vlgmr.msra.gmra.mxu0 %vm472_vm0, %v469_v0  ;;  %560 = vmatpush.msra.mxu2 %v545_v8  ;;  %v536_v17 = vld [vmem:[#allocation10 + $0x8] sm:$0xff]  ;;  %v535_v19 = vld [vmem:[#allocation10] sm:$0xff]  ;;  %v598_v25 = vld [vmem:[#allocation11 + $0x18] sm:$0xff] }
  0x50   : > { %v597_v26 = vld [vmem:[#allocation11 + $0x10] sm:$0xff]  ;;  %614 = vmatpush.msra.mxu3 %v598_v25  ;;  %v596_v27 = vld [vmem:[#allocation11 + $0x8] sm:$0xff]  ;;  %v595_v28 = vld [vmem:[#allocation11] sm:$0xff] }
  0x51   : > { %561 = vmatpush.msra.mxu2 %v544_v9  ;;  %v966_v29 = vld [vmem:[%s1537_s6] ss:$0 sm:$0xff]  ;;  %s857_s16 = sshll.u32 %s1572_s10, 3 }
  0x52   : > { %615 = vmatpush.msra.mxu3 %v597_v26  ;;  %s656_s1 = scalar_lea.hbm %s1574_s18, %s857_s16  ;;  %s1173_s4 = scalar_lea.hbm %s1574_s18, 16 }
  0x53   : > { %562 = vmatpush.msra.mxu2 %v543_v10  ;;  %s660_s11 = sshll.u32 %s656_s1, 4  ;;  %s661_s11 = int_to_ptr.hbm [resolvable:$true] %s660_s11 }
  0x54   : > { %616 = vmatpush.msra.mxu3 %v596_v27  ;;  %s1167_s21 = sshra.s32 %s661_s11, 4  ;;  %s1168_s21 = int_to_ptr.hbm [resolvable:$true] %s1167_s21 }
  0x55   : > { %563 = vmatpush.msra.mxu2 %v542_v11  ;;  %s1169_s19 = scalar_lea.hbm %s1168_s21, 8  ;;  %p1174_p8 = scmp.lt.s32.totalorder %s1168_s21, %s1574_s18 }
  0x56   : > { %617 = vmatpush.msra.mxu3 %v595_v28  ;;  %p1170_p1 = scmp.ne.s32.totalorder %s1168_s21, %s1169_s19  ;;  %p1175_p10 = scmp.lt.s32.totalorder %s1173_s4, %s1169_s19 }
  0x57   : > { %564 = vmatpush.msra.mxu2 %v541_v12 }
  0x58   : > { %p1171_p2 = pnand %p1170_p1, %p1381_p5  ;;  %p1176_p11 = por %p1175_p10, %p1174_p8 }
  0x59   : > { %565 = vmatpush.msra.mxu2 %v540_v13 }
  0x5a   : > { %p1172_p4 = pneg %p1171_p2 }
  0x5b   : > { %566 = vmatpush.msra.mxu2 %v539_v14 }
  0x5c   : > { %p1177_p12 = pnand %p1176_p11, %p1172_p4 }
  0x5d   : > { %567 = vmatpush.msra.mxu2 %v538_v15 }
  0x5f   : > { %568 = vmatpush.msra.mxu2 %v537_v16 }
  0x61   : > { %569 = vmatpush.msra.mxu2 %v536_v17 }
  0x63   : > { %570 = vmatpush.msra.mxu2 %v535_v19 }
  0xa8   : > { %v630_v50 = vpop.permute.xlu2 %629 }
  0xbc   : > { %v499_v5 = vpop.permute.xlu0 %498 }
  0xbd   : > { %852 = vmatmul.msk.f32.vlgmr.msra.gmra.mxu1 %vm472_vm0, %v499_v5 }
  0xbe   : > { %v529_v21 = vpop.permute.xlu1 %528 }
  0xcc   : > { %v493_v20 = vpop.f32.mrf.mxu0 }
 0x13a   : > { %v519_v18 = vpop.f32.mrf.mxu1 }
 0x13b   : > { %524 = vrot.lane.b32.xlu0 %v519_v18, %s1259_s9 }
 0x1ad   : > { %v525_v22 = vpop.permute.xlu0 %524 }
 0x1ae   : > { %v532_v23 = vsel %vm531_vm1, %v493_v20, %v525_v22 }
 0x1af   : > { %v534_v24 = vsel %vm533_vm2, %v532_v23, %v529_v21 }
 0x1b0   : > { %853 = vmatmul.msk.f32.vlgmr.msra.gmra.mxu2 %vm551_vm3, %v534_v24 }
 0x233   : > { %v572_v30 = vpop.f32.mrf.mxu2 }
 0x234   : > { %v573_v31 = vadd.f32 %v966_v29, %v572_v30 }
 0x236   : > { %v854_v32 = vmul.f32 -1.442695, %v573_v31 }
 0x238   : > { %967 = vpow2.f32 %v854_v32 }
 0x23e   : > { %v968_v33 = vpop.eup %967 }
 0x23f   : > { %v578_v34 = vadd.f32 1.0, %v968_v33 }
 0x241   : > { %969 = vrcp.f32 %v578_v34  ;;  %v590_v38 = vand.u32 2147483648, %v578_v34  ;;  %v588_v40 = vand.u32 2147483647, %v578_v34  ;;  %vm584_vm5 = vweird.f32 %v578_v34 }
 0x243   : > { %v591_v42 = vor.u32 1.1754944e-38, %v590_v38  ;;  %vm589_vm7 = vcmp.eq.f32.partialorder %v588_v40, 8.507059e+37 }
 0x247   : > { %v970_v35 = vpop.eup %969 }
 0x248   : > { %v580_v36 = vmul.f32 %v970_v35, %v578_v34  ;;  %vm585_vm4 = vweird.f32 %v970_v35 }
 0x249   : > { %vm586_vm6 = vmor %vm584_vm5, %vm585_vm4 }
 0x24a   : > { %v581_v37 = vsub.f32 1.0, %v580_v36 }
 0x24c   : > { %v582_v39 = vmul.f32 %v970_v35, %v581_v37 }
 0x24e   : > { %v583_v41 = vadd.f32 %v970_v35, %v582_v39 }
 0x250   : > { %v587_v43 = vsel %vm586_vm6, %v970_v35, %v583_v41 }
 0x251   : > { %v592_v44 = vsel %vm589_vm7, %v591_v42, %v587_v43 }
 0x252   : > { %v594_v45 = vmul.f32 %v592_v44, %v1479_v6  ;;  %v628_v51 = vsub.f32 1.0, %v592_v44 }
 0x254   : > { %855 = vmatmul.msk.f32.vlgmr.msra.gmra.mxu3 %vm531_vm1, %v594_v45  ;;  %v632_v53 = vmul.f32 %v630_v50, %v628_v51 }
 0x2d7   : > { %v619_v46 = vpop.f32.mrf.mxu3 }
 0x2d8   : > { %623 = vrot.lane.b32.xlu1 %v619_v46, %s1258_s30 }
 0x34a   : > { %v624_v47 = vpop.permute.xlu1 %623 }
 0x34b   : > { %v626_v48 = vadd.f32 %v624_v47, %v573_v31 }
 0x34d   : > { %971 = vtanh.f32 %v626_v48 }
 0x353   : > { %v972_v49 = vpop.eup %971 }
 0x354   : > { %634 = vrot.lane.b32.xlu2 %v972_v49, %s1260_s12 }
 0x3ae   : > { %v635_v52 = vpop.permute.xlu2 %634 }
 0x3af   : > { %v637_v54 = vmul.f32 %v635_v52, %v592_v44 }
 0x3b1   : > { %v638_v55 = vadd.f32 %v637_v54, %v632_v53 }
 0x3b3   : > { %640 = vrot.lane.b32.xlu0 %v638_v55, %s1260_s12 }
 0x425   : > { %v641_v56 = vpop.permute.xlu0 %640 }
 0x426   : > { %643 = vst.msk [vmem:[%s468_s24] sm:$0xff] %vm531_vm1, %v641_v56 }
 0x427   : > { %1180 = shalt.err (!%p1177_p12)
}
 0x428   : > { %878 = dma.vmem_to_hbm [thread:$0]  (%p1381_p5), %s659_s14, 128, %s661_s11, %s645_s13  }
 0x429 PF: > { %s1575_s8 = sld [smem:[#allocation20_spill]]  ;;  %p1577_p13 = scmp.ge.s32.totalorder %s1251_s29, 2 }
 0x42b   : > { %p901_p0 = pnand %p1577_p13, %p1346_p6 }
 0x42d   : > { %p902_p3 = pneg %p901_p0 }
 0x42f   : > { %s672_s27 = sand.u32 1, %s1575_s8  }
 0x430   : > { %s673_s17 = scalar_lea.sflag [#allocation4], %s672_s27 }
 0x431   : > { %1226 = dma.done.wait (%p902_p3), %s673_s17, 128  }
 0x432   : > { %1228 = vsyncadd (%p902_p3), %s673_s17, 4294967168  ;;  %s30_s29 = sadd.s32 1, %s1251_s29   ;;  %s1578_s10 = sld [smem:[#allocation21_spill]] }
 0x433   : > { %p27_p7 = scmp.ge.s32.totalorder %s30_s29, 4   ;;  %s1579_s26 = sld [smem:[#allocation26_spill]] }
 0x434   : > { %s1580_s12 = sld [smem:[#allocation24_spill]]  ;;  %s1581_s24 = smov %s1235_s25 }
 0x435   : > { %s1583_s27 = smov %s1247_s28 }
 0x436   :  { %29 = sbr.rel (!%p27_p7) target bundleno = 15 (0xf), region = 138 }
 0x438   : > { %s1582_s25 = smov %s1578_s10 }
 0x43a   : > { %s1584_s28 = smov %s1580_s12 }
 0x43b   :  { %679 = vsyncpa [#allocation3], 1 }
 0x43c   :  { %681 = vsyncpa [#allocation3 + $0x1], 1 }
 0x43d   :  { %682 = vsyncpa [#allocation6], 1 }
 0x43e   :  { %684 = vsyncpa [#allocation6 + $0x1], 1 }
 0x43f   :  { %685 = vsyncpa [#allocation9], 1 }
 0x440   :  { %687 = vsyncpa [#allocation9 + $0x1], 1 }
 0x441   :  { %688 = vsyncpa [#allocation12], 1 }
 0x442   :  { %689 = vsyncpa [#allocation4], 1 }
 0x443   :  { %691 = vsyncpa [#allocation4 + $0x1], 1 }

</bundles_post_ra>
